<compile_context>
chip_gen: v7x
topology: tpu7x:2x2x1
jax: 0.10.0
libtpu: 0.0.40
codegen_flags: <defaults>
</compile_context>

<pallas_src>
import functools

import jax
import jax.numpy as jnp
from jax import lax
from jax.experimental import pallas as pl
from jax.experimental.pallas import tpu as pltpu

KEEP_THRE = 0.05  # cfg.WaveGC.keep_thre


# ----------------------------- Pallas kernel ------------------------------- #

def _wave_conv_kernel(u_ref, s_ref, x_ref, w_all_ref, b_all_ref, wf_ref, bf_ref,
                      o_ref, comb_ref, *, keep_thre, branch_outs):
    """All T wavelet branches + fusion Linear in one launch.

    u_ref:     [N, N]  eigenvectors U (f32)
    s_ref:     [T, N]  filter signals (one row per scale)
    x_ref:     [N, D]  node features
    w_all_ref: [D, H]  stacked GCN weights [W_0 | ... | W_{T-1}]
    b_all_ref: [1, H]  stacked GCN biases
    wf_ref:    [H, H]  fusion weight     bf_ref: [1, H] fusion bias
    o_ref:     [N, H]  final embedding (output)
    comb_ref:  [N, H]  VMEM scratch holding the concatenated branch outputs
    """
    f32 = jnp.float32
    bf16 = jnp.bfloat16

    u = u_ref[...]          # loaded once for all branches
    s_all = s_ref[...]      # [T, N]
    b_all = b_all_ref[...]  # [1, H]

    # xw_all = x @ W_all computed once for all branches (bf16 operands, f32 accumulation).
    xw_all = lax.dot_general(x_ref[...].astype(bf16), w_all_ref[...].astype(bf16),
                             (((1,), (0,)), ((), ())), preferred_element_type=f32)
    xw_all = xw_all.astype(bf16)  # MXU operand for the per-branch propagation matmuls

    # dot_general contraction patterns: let the MXU consume the transposed operand,
    # no explicit .T materialization of [N, N] temporaries.
    c_last = (((1,), (1,)), ((), ()))    # A @ B^T
    c_first = (((0,), (0,)), ((), ()))   # A^T @ B

    off = 0
    for t, o_t in enumerate(branch_outs):          # T is small & static -> unrolled
        s_t = s_all[t:t + 1, :]                    # [1, N]

        # F_t = U @ diag(s_t) @ U^T == (U * s_t) @ U^T.  Kept in f32 so the
        # threshold comparison below matches the reference exactly.
        f = lax.dot_general(u * s_t, u, c_last, preferred_element_type=f32)   # [N, N]

        # F.normalize (dim=1, eps=1e-12) fused with thresholding: rsqrt on EUP,
        # clamp the squared sum at eps^2 = 1e-24, single normalized temporary.
        inv = lax.rsqrt(jnp.maximum(jnp.sum(f * f, axis=0, keepdims=True), 1e-24))
        fn = f * inv
        m = jnp.where(jnp.abs(fn) > keep_thre, fn, 0.0).astype(bf16)   # strict '>'

        # GCNConv(dim_h, O_t, normalize=False): h = M^T @ (x @ W_t) + b_t ; ReLU (dropout p=0)
        h = lax.dot_general(m, xw_all[:, off:off + o_t], c_first,
                            preferred_element_type=f32)                # [N, O_t]
        h = jnp.maximum(h + b_all[:, off:off + o_t], 0.0)

        # SimpleConv (sum aggregation): h = M^T @ h
        h = lax.dot_general(m, h.astype(bf16), c_first, preferred_element_type=f32)

        comb_ref[:, off:off + o_t] = h             # comb stays resident in VMEM
        off += o_t

    # Fusion Linear + ReLU fused into the same launch (dropout p=0 -> identity).
    comb = comb_ref[...]
    y = lax.dot_general(comb.astype(bf16), wf_ref[...].astype(bf16),
                        (((1,), (0,)), ((), ())), preferred_element_type=f32)
    o_ref[...] = jnp.maximum(y + bf_ref[...], 0.0)


# ------------------------------- Wrapper ----------------------------------- #

def _vmem_budget_bytes(N, D, H, T):
    """Rough live-set estimate (f32 words) with generous headroom, clamped so the
    same limit is valid on v5e (16 MiB scoped default) and v7x (64 MiB physical)."""
    words = 3 * N * N + T * N + N * D + D * H + 3 * N * H + H * H + 4 * H
    return int(min(max(8 * words * 4, 4 << 20), 48 << 20))


def wave_conv_forward(x, eigenvector, filter_signals_after, params, keep_thre=KEEP_THRE):
    """Dense-equivalent forward of Wave_Conv. One pallas_call, whole-array VMEM blocks."""
    N, D = x.shape
    T = filter_signals_after.shape[-1]
    H = params["fusion_w"].shape[1]                       # dim_h

    # Stack per-branch GCN params once on the host side.
    w_all = jnp.concatenate(params["gcn_w"], axis=1).astype(jnp.float32)     # [D, H]
    b_all = jnp.concatenate(params["gcn_b"], axis=0).reshape(1, H).astype(jnp.float32)
    branch_outs = tuple(int(w.shape[1]) for w in params["gcn_w"])

    # curr_signals = filter_signals_after.transpose(2, 1)[0]  -> [T, N]
    s_all = jnp.transpose(filter_signals_after[0], (1, 0)).astype(jnp.float32)

    vmem = pl.BlockSpec(memory_space=pltpu.MemorySpace.VMEM)
    kernel = functools.partial(_wave_conv_kernel, keep_thre=keep_thre,
                               branch_outs=branch_outs)

    out = pl.pallas_call(
        kernel,
        out_shape=jax.ShapeDtypeStruct((N, H), jnp.float32),
        in_specs=[vmem] * 7,
        out_specs=vmem,
        scratch_shapes=[pltpu.VMEM((N, H), jnp.float32)],
        compiler_params=pltpu.CompilerParams(
            vmem_limit_bytes=_vmem_budget_bytes(N, D, H, T)),
    )(eigenvector.astype(jnp.float32), s_all, x.astype(jnp.float32),
      w_all, b_all, params["fusion_w"].astype(jnp.float32),
      params["fusion_b"].reshape(1, H).astype(jnp.float32))
    return out


def init_params(key, dim_h, num_J):
    """Deterministic synthetic parameters matching Wave_Conv.__init__ shapes."""
    t_number = num_J + 1
    single_out = dim_h // t_number
    single_out_last = dim_h - num_J * single_out
    outs = [single_out] * num_J + [single_out_last]

    keys = jax.random.split(key, 2 * t_number + 2)
    gcn_w = [jax.random.normal(keys[2 * i], (dim_h, outs[i]), jnp.float32) * 0.1
             for i in range(t_number)]
    gcn_b = [jax.random.normal(keys[2 * i + 1], (outs[i],), jnp.float32) * 0.01
             for i in range(t_number)]
    fusion_w = jax.random.normal(keys[-2], (dim_h, dim_h), jnp.float32) * 0.1
    fusion_b = jax.random.normal(keys[-1], (dim_h,), jnp.float32) * 0.01
    return {"gcn_w": gcn_w, "gcn_b": gcn_b, "fusion_w": fusion_w, "fusion_b": fusion_b}


if __name__ == "__main__":
    N = 16          # number of graph nodes
    dim_h = 32
    num_J = 3       # -> t_number = 4, single_out = single_out_last = 8
    t_number = num_J + 1

    key = jax.random.PRNGKey(0)
    k_x, k_u, k_s, k_p = jax.random.split(key, 4)

    # node features, eigenvectors, and filter signals (same shapes/conventions as `batch.*`)
    x = jax.random.normal(k_x, (N, dim_h), jnp.float32)
    sym = jax.random.normal(k_u, (N, N), jnp.float32)
    _, eigenvector = jnp.linalg.eigh(sym + sym.T)                 # [N, N] orthonormal columns
    eigenvector = eigenvector.astype(jnp.float32)
    filter_signals_after = jax.random.uniform(k_s, (1, N, t_number), jnp.float32)

    params = init_params(k_p, dim_h, num_J)

    out = wave_conv_forward(x, eigenvector, filter_signals_after, params)
    out = jax.block_until_ready(out)

    assert out.shape == (N, dim_h) and out.dtype == jnp.float32
    # TODO(synk): if many graphs/timesteps are processed, batch them into a leading grid
    # dimension (parallel semantics) so the MXU/lanes are not <2% utilized per launch.
    print("KERNEL_OK")
</pallas_src>

<mosaic_0001>
module attributes {stable_mosaic.version = 11 : i64} {
  func.func @_wave_conv_kernel(%arg0: memref<16x16xf32, #tpu.memory_space<vmem>>, %arg1: memref<4x16xf32, #tpu.memory_space<vmem>>, %arg2: memref<16x32xf32, #tpu.memory_space<vmem>>, %arg3: memref<32x32xf32, #tpu.memory_space<vmem>>, %arg4: memref<1x32xf32, #tpu.memory_space<vmem>>, %arg5: memref<32x32xf32, #tpu.memory_space<vmem>>, %arg6: memref<1x32xf32, #tpu.memory_space<vmem>>, %arg7: memref<16x32xf32, #tpu.memory_space<vmem>>, %arg8: memref<16x32xf32, #tpu.memory_space<vmem>>) attributes {dimension_semantics = [], scalar_prefetch = 0 : i64, scratch_operands = 1 : i64, tpu.core_type = #tpu.core_type<tc>} {
    %c0 = arith.constant 0 : index
    %c0_0 = arith.constant 0 : index
    %0 = vector.load %arg0[%c0, %c0_0] : memref<16x16xf32, #tpu.memory_space<vmem>>, vector<16x16xf32>
    %c0_1 = arith.constant 0 : index
    %c0_2 = arith.constant 0 : index
    %1 = vector.load %arg1[%c0_1, %c0_2] : memref<4x16xf32, #tpu.memory_space<vmem>>, vector<4x16xf32>
    %c0_3 = arith.constant 0 : index
    %c0_4 = arith.constant 0 : index
    %2 = vector.load %arg4[%c0_3, %c0_4] : memref<1x32xf32, #tpu.memory_space<vmem>>, vector<1x32xf32>
    %c0_5 = arith.constant 0 : index
    %c0_6 = arith.constant 0 : index
    %3 = vector.load %arg2[%c0_5, %c0_6] : memref<16x32xf32, #tpu.memory_space<vmem>>, vector<16x32xf32>
    %4 = arith.truncf %3 : vector<16x32xf32> to vector<16x32xbf16>
    %c0_7 = arith.constant 0 : index
    %c0_8 = arith.constant 0 : index
    %5 = vector.load %arg3[%c0_7, %c0_8] : memref<32x32xf32, #tpu.memory_space<vmem>>, vector<32x32xf32>
    %6 = arith.truncf %5 : vector<32x32xf32> to vector<32x32xbf16>
    %cst = arith.constant dense<0.000000e+00> : vector<16x32xf32>
    %7 = tpu.matmul %4, %6, %cst {dimension_numbers = #tpu.dot_dimension_numbers<[1], [0], [0], [1], [0, 0, 1, 1], [], []>} : vector<16x32xbf16>, vector<32x32xbf16>, vector<16x32xf32> -> vector<16x32xf32>
    %8 = arith.truncf %7 : vector<16x32xf32> to vector<16x32xbf16>
    %9 = vector.extract_strided_slice %1 {offsets = [0, 0], sizes = [1, 16], strides = [1, 1]} : vector<4x16xf32> to vector<1x16xf32>
    %10 = vector.broadcast %9 : vector<1x16xf32> to vector<16x16xf32>
    %11 = arith.mulf %0, %10 : vector<16x16xf32>
    %cst_9 = arith.constant dense<0.000000e+00> : vector<16x16xf32>
    %12 = tpu.matmul %11, %0, %cst_9 {dimension_numbers = #tpu.dot_dimension_numbers<[1], [1], [0], [0], [0, 0, 1, 0], [], []>} : vector<16x16xf32>, vector<16x16xf32>, vector<16x16xf32> -> vector<16x16xf32>
    %13 = arith.mulf %12, %12 : vector<16x16xf32>
    %cst_10 = arith.constant dense<0.000000e+00> : vector<16xf32>
    %14 = vector.multi_reduction <add>, %13, %cst_10 [0] : vector<16x16xf32> to vector<16xf32>
    %15 = vector.shape_cast %14 : vector<16xf32> to vector<1x16xf32>
    %cst_11 = arith.constant 1.000000e-24 : f32
    %16 = vector.broadcast %cst_11 : f32 to vector<1x16xf32>
    %17 = arith.maximumf %15, %16 : vector<1x16xf32>
    %18 = math.rsqrt %17 : vector<1x16xf32>
    %19 = vector.broadcast %18 : vector<1x16xf32> to vector<16x16xf32>
    %20 = arith.mulf %12, %19 : vector<16x16xf32>
    %21 = math.absf %20 : vector<16x16xf32>
    %cst_12 = arith.constant 5.000000e-02 : f32
    %22 = vector.broadcast %cst_12 : f32 to vector<16x16xf32>
    %23 = arith.cmpf ogt, %21, %22 : vector<16x16xf32>
    %cst_13 = arith.constant 0.000000e+00 : f32
    %24 = vector.broadcast %cst_13 : f32 to vector<16x16xf32>
    %25 = arith.select %23, %20, %24 : vector<16x16xi1>, vector<16x16xf32>
    %26 = arith.truncf %25 : vector<16x16xf32> to vector<16x16xbf16>
    %27 = vector.extract_strided_slice %8 {offsets = [0, 0], sizes = [16, 8], strides = [1, 1]} : vector<16x32xbf16> to vector<16x8xbf16>
    %cst_14 = arith.constant dense<0.000000e+00> : vector<16x8xf32>
    %28 = tpu.matmul %26, %27, %cst_14 {dimension_numbers = #tpu.dot_dimension_numbers<[0], [0], [1], [1], [0, 1, 1, 1], [], []>} : vector<16x16xbf16>, vector<16x8xbf16>, vector<16x8xf32> -> vector<16x8xf32>
    %29 = vector.extract_strided_slice %2 {offsets = [0, 0], sizes = [1, 8], strides = [1, 1]} : vector<1x32xf32> to vector<1x8xf32>
    %30 = vector.broadcast %29 : vector<1x8xf32> to vector<16x8xf32>
    %31 = arith.addf %28, %30 : vector<16x8xf32>
    %cst_15 = arith.constant 0.000000e+00 : f32
    %32 = vector.broadcast %cst_15 : f32 to vector<16x8xf32>
    %33 = arith.maximumf %31, %32 : vector<16x8xf32>
    %34 = arith.truncf %33 : vector<16x8xf32> to vector<16x8xbf16>
    %cst_16 = arith.constant dense<0.000000e+00> : vector<16x8xf32>
    %35 = tpu.matmul %26, %34, %cst_16 {dimension_numbers = #tpu.dot_dimension_numbers<[0], [0], [1], [1], [0, 1, 1, 1], [], []>} : vector<16x16xbf16>, vector<16x8xbf16>, vector<16x8xf32> -> vector<16x8xf32>
    %c0_17 = arith.constant 0 : index
    %c0_18 = arith.constant 0 : index
    %36 = vector.load %arg8[%c0_17, %c0_18] : memref<16x32xf32, #tpu.memory_space<vmem>>, vector<16x8xf32>
    tpu.vector_store %arg8[%c0_17, %c0_18], %35 {strides = array<i32>} : memref<16x32xf32, #tpu.memory_space<vmem>>, vector<16x8xf32>,
    %37 = vector.extract_strided_slice %1 {offsets = [1, 0], sizes = [1, 16], strides = [1, 1]} : vector<4x16xf32> to vector<1x16xf32>
    %38 = vector.broadcast %37 : vector<1x16xf32> to vector<16x16xf32>
    %39 = arith.mulf %0, %38 : vector<16x16xf32>
    %cst_19 = arith.constant dense<0.000000e+00> : vector<16x16xf32>
    %40 = tpu.matmul %39, %0, %cst_19 {dimension_numbers = #tpu.dot_dimension_numbers<[1], [1], [0], [0], [0, 0, 1, 0], [], []>} : vector<16x16xf32>, vector<16x16xf32>, vector<16x16xf32> -> vector<16x16xf32>
    %41 = arith.mulf %40, %40 : vector<16x16xf32>
    %cst_20 = arith.constant dense<0.000000e+00> : vector<16xf32>
    %42 = vector.multi_reduction <add>, %41, %cst_20 [0] : vector<16x16xf32> to vector<16xf32>
    %43 = vector.shape_cast %42 : vector<16xf32> to vector<1x16xf32>
    %cst_21 = arith.constant 1.000000e-24 : f32
    %44 = vector.broadcast %cst_21 : f32 to vector<1x16xf32>
    %45 = arith.maximumf %43, %44 : vector<1x16xf32>
    %46 = math.rsqrt %45 : vector<1x16xf32>
    %47 = vector.broadcast %46 : vector<1x16xf32> to vector<16x16xf32>
    %48 = arith.mulf %40, %47 : vector<16x16xf32>
    %49 = math.absf %48 : vector<16x16xf32>
    %cst_22 = arith.constant 5.000000e-02 : f32
    %50 = vector.broadcast %cst_22 : f32 to vector<16x16xf32>
    %51 = arith.cmpf ogt, %49, %50 : vector<16x16xf32>
    %cst_23 = arith.constant 0.000000e+00 : f32
    %52 = vector.broadcast %cst_23 : f32 to vector<16x16xf32>
    %53 = arith.select %51, %48, %52 : vector<16x16xi1>, vector<16x16xf32>
    %54 = arith.truncf %53 : vector<16x16xf32> to vector<16x16xbf16>
    %55 = vector.extract_strided_slice %8 {offsets = [0, 8], sizes = [16, 8], strides = [1, 1]} : vector<16x32xbf16> to vector<16x8xbf16>
    %cst_24 = arith.constant dense<0.000000e+00> : vector<16x8xf32>
    %56 = tpu.matmul %54, %55, %cst_24 {dimension_numbers = #tpu.dot_dimension_numbers<[0], [0], [1], [1], [0, 1, 1, 1], [], []>} : vector<16x16xbf16>, vector<16x8xbf16>, vector<16x8xf32> -> vector<16x8xf32>
    %57 = vector.extract_strided_slice %2 {offsets = [0, 8], sizes = [1, 8], strides = [1, 1]} : vector<1x32xf32> to vector<1x8xf32>
    %58 = vector.broadcast %57 : vector<1x8xf32> to vector<16x8xf32>
    %59 = arith.addf %56, %58 : vector<16x8xf32>
    %cst_25 = arith.constant 0.000000e+00 : f32
    %60 = vector.broadcast %cst_25 : f32 to vector<16x8xf32>
    %61 = arith.maximumf %59, %60 : vector<16x8xf32>
    %62 = arith.truncf %61 : vector<16x8xf32> to vector<16x8xbf16>
    %cst_26 = arith.constant dense<0.000000e+00> : vector<16x8xf32>
    %63 = tpu.matmul %54, %62, %cst_26 {dimension_numbers = #tpu.dot_dimension_numbers<[0], [0], [1], [1], [0, 1, 1, 1], [], []>} : vector<16x16xbf16>, vector<16x8xbf16>, vector<16x8xf32> -> vector<16x8xf32>
    %c0_27 = arith.constant 0 : index
    %c8 = arith.constant 8 : index
    %64 = vector.load %arg8[%c0_27, %c8] : memref<16x32xf32, #tpu.memory_space<vmem>>, vector<16x8xf32>
    tpu.vector_store %arg8[%c0_27, %c8], %63 {strides = array<i32>} : memref<16x32xf32, #tpu.memory_space<vmem>>, vector<16x8xf32>,
    %65 = vector.extract_strided_slice %1 {offsets = [2, 0], sizes = [1, 16], strides = [1, 1]} : vector<4x16xf32> to vector<1x16xf32>
    %66 = vector.broadcast %65 : vector<1x16xf32> to vector<16x16xf32>
    %67 = arith.mulf %0, %66 : vector<16x16xf32>
    %cst_28 = arith.constant dense<0.000000e+00> : vector<16x16xf32>
    %68 = tpu.matmul %67, %0, %cst_28 {dimension_numbers = #tpu.dot_dimension_numbers<[1], [1], [0], [0], [0, 0, 1, 0], [], []>} : vector<16x16xf32>, vector<16x16xf32>, vector<16x16xf32> -> vector<16x16xf32>
    %69 = arith.mulf %68, %68 : vector<16x16xf32>
    %cst_29 = arith.constant dense<0.000000e+00> : vector<16xf32>
    %70 = vector.multi_reduction <add>, %69, %cst_29 [0] : vector<16x16xf32> to vector<16xf32>
    %71 = vector.shape_cast %70 : vector<16xf32> to vector<1x16xf32>
    %cst_30 = arith.constant 1.000000e-24 : f32
    %72 = vector.broadcast %cst_30 : f32 to vector<1x16xf32>
    %73 = arith.maximumf %71, %72 : vector<1x16xf32>
    %74 = math.rsqrt %73 : vector<1x16xf32>
    %75 = vector.broadcast %74 : vector<1x16xf32> to vector<16x16xf32>
    %76 = arith.mulf %68, %75 : vector<16x16xf32>
    %77 = math.absf %76 : vector<16x16xf32>
    %cst_31 = arith.constant 5.000000e-02 : f32
    %78 = vector.broadcast %cst_31 : f32 to vector<16x16xf32>
    %79 = arith.cmpf ogt, %77, %78 : vector<16x16xf32>
    %cst_32 = arith.constant 0.000000e+00 : f32
    %80 = vector.broadcast %cst_32 : f32 to vector<16x16xf32>
    %81 = arith.select %79, %76, %80 : vector<16x16xi1>, vector<16x16xf32>
    %82 = arith.truncf %81 : vector<16x16xf32> to vector<16x16xbf16>
    %83 = vector.extract_strided_slice %8 {offsets = [0, 16], sizes = [16, 8], strides = [1, 1]} : vector<16x32xbf16> to vector<16x8xbf16>
    %cst_33 = arith.constant dense<0.000000e+00> : vector<16x8xf32>
    %84 = tpu.matmul %82, %83, %cst_33 {dimension_numbers = #tpu.dot_dimension_numbers<[0], [0], [1], [1], [0, 1, 1, 1], [], []>} : vector<16x16xbf16>, vector<16x8xbf16>, vector<16x8xf32> -> vector<16x8xf32>
    %85 = vector.extract_strided_slice %2 {offsets = [0, 16], sizes = [1, 8], strides = [1, 1]} : vector<1x32xf32> to vector<1x8xf32>
    %86 = vector.broadcast %85 : vector<1x8xf32> to vector<16x8xf32>
    %87 = arith.addf %84, %86 : vector<16x8xf32>
    %cst_34 = arith.constant 0.000000e+00 : f32
    %88 = vector.broadcast %cst_34 : f32 to vector<16x8xf32>
    %89 = arith.maximumf %87, %88 : vector<16x8xf32>
    %90 = arith.truncf %89 : vector<16x8xf32> to vector<16x8xbf16>
    %cst_35 = arith.constant dense<0.000000e+00> : vector<16x8xf32>
    %91 = tpu.matmul %82, %90, %cst_35 {dimension_numbers = #tpu.dot_dimension_numbers<[0], [0], [1], [1], [0, 1, 1, 1], [], []>} : vector<16x16xbf16>, vector<16x8xbf16>, vector<16x8xf32> -> vector<16x8xf32>
    %c0_36 = arith.constant 0 : index
    %c16 = arith.constant 16 : index
    %92 = vector.load %arg8[%c0_36, %c16] : memref<16x32xf32, #tpu.memory_space<vmem>>, vector<16x8xf32>
    tpu.vector_store %arg8[%c0_36, %c16], %91 {strides = array<i32>} : memref<16x32xf32, #tpu.memory_space<vmem>>, vector<16x8xf32>,
    %93 = vector.extract_strided_slice %1 {offsets = [3, 0], sizes = [1, 16], strides = [1, 1]} : vector<4x16xf32> to vector<1x16xf32>
    %94 = vector.broadcast %93 : vector<1x16xf32> to vector<16x16xf32>
    %95 = arith.mulf %0, %94 : vector<16x16xf32>
    %cst_37 = arith.constant dense<0.000000e+00> : vector<16x16xf32>
    %96 = tpu.matmul %95, %0, %cst_37 {dimension_numbers = #tpu.dot_dimension_numbers<[1], [1], [0], [0], [0, 0, 1, 0], [], []>} : vector<16x16xf32>, vector<16x16xf32>, vector<16x16xf32> -> vector<16x16xf32>
    %97 = arith.mulf %96, %96 : vector<16x16xf32>
    %cst_38 = arith.constant dense<0.000000e+00> : vector<16xf32>
    %98 = vector.multi_reduction <add>, %97, %cst_38 [0] : vector<16x16xf32> to vector<16xf32>
    %99 = vector.shape_cast %98 : vector<16xf32> to vector<1x16xf32>
    %cst_39 = arith.constant 1.000000e-24 : f32
    %100 = vector.broadcast %cst_39 : f32 to vector<1x16xf32>
    %101 = arith.maximumf %99, %100 : vector<1x16xf32>
    %102 = math.rsqrt %101 : vector<1x16xf32>
    %103 = vector.broadcast %102 : vector<1x16xf32> to vector<16x16xf32>
    %104 = arith.mulf %96, %103 : vector<16x16xf32>
    %105 = math.absf %104 : vector<16x16xf32>
    %cst_40 = arith.constant 5.000000e-02 : f32
    %106 = vector.broadcast %cst_40 : f32 to vector<16x16xf32>
    %107 = arith.cmpf ogt, %105, %106 : vector<16x16xf32>
    %cst_41 = arith.constant 0.000000e+00 : f32
    %108 = vector.broadcast %cst_41 : f32 to vector<16x16xf32>
    %109 = arith.select %107, %104, %108 : vector<16x16xi1>, vector<16x16xf32>
    %110 = arith.truncf %109 : vector<16x16xf32> to vector<16x16xbf16>
    %111 = vector.extract_strided_slice %8 {offsets = [0, 24], sizes = [16, 8], strides = [1, 1]} : vector<16x32xbf16> to vector<16x8xbf16>
    %cst_42 = arith.constant dense<0.000000e+00> : vector<16x8xf32>
    %112 = tpu.matmul %110, %111, %cst_42 {dimension_numbers = #tpu.dot_dimension_numbers<[0], [0], [1], [1], [0, 1, 1, 1], [], []>} : vector<16x16xbf16>, vector<16x8xbf16>, vector<16x8xf32> -> vector<16x8xf32>
    %113 = vector.extract_strided_slice %2 {offsets = [0, 24], sizes = [1, 8], strides = [1, 1]} : vector<1x32xf32> to vector<1x8xf32>
    %114 = vector.broadcast %113 : vector<1x8xf32> to vector<16x8xf32>
    %115 = arith.addf %112, %114 : vector<16x8xf32>
    %cst_43 = arith.constant 0.000000e+00 : f32
    %116 = vector.broadcast %cst_43 : f32 to vector<16x8xf32>
    %117 = arith.maximumf %115, %116 : vector<16x8xf32>
    %118 = arith.truncf %117 : vector<16x8xf32> to vector<16x8xbf16>
    %cst_44 = arith.constant dense<0.000000e+00> : vector<16x8xf32>
    %119 = tpu.matmul %110, %118, %cst_44 {dimension_numbers = #tpu.dot_dimension_numbers<[0], [0], [1], [1], [0, 1, 1, 1], [], []>} : vector<16x16xbf16>, vector<16x8xbf16>, vector<16x8xf32> -> vector<16x8xf32>
    %c0_45 = arith.constant 0 : index
    %c24 = arith.constant 24 : index
    %120 = vector.load %arg8[%c0_45, %c24] : memref<16x32xf32, #tpu.memory_space<vmem>>, vector<16x8xf32>
    tpu.vector_store %arg8[%c0_45, %c24], %119 {strides = array<i32>} : memref<16x32xf32, #tpu.memory_space<vmem>>, vector<16x8xf32>,
    %c0_46 = arith.constant 0 : index
    %c0_47 = arith.constant 0 : index
    %121 = vector.load %arg8[%c0_46, %c0_47] : memref<16x32xf32, #tpu.memory_space<vmem>>, vector<16x32xf32>
    %122 = arith.truncf %121 : vector<16x32xf32> to vector<16x32xbf16>
    %c0_48 = arith.constant 0 : index
    %c0_49 = arith.constant 0 : index
    %123 = vector.load %arg5[%c0_48, %c0_49] : memref<32x32xf32, #tpu.memory_space<vmem>>, vector<32x32xf32>
    %124 = arith.truncf %123 : vector<32x32xf32> to vector<32x32xbf16>
    %cst_50 = arith.constant dense<0.000000e+00> : vector<16x32xf32>
    %125 = tpu.matmul %122, %124, %cst_50 {dimension_numbers = #tpu.dot_dimension_numbers<[1], [0], [0], [1], [0, 0, 1, 1], [], []>} : vector<16x32xbf16>, vector<32x32xbf16>, vector<16x32xf32> -> vector<16x32xf32>
    %c0_51 = arith.constant 0 : index
    %c0_52 = arith.constant 0 : index
    %126 = vector.load %arg6[%c0_51, %c0_52] : memref<1x32xf32, #tpu.memory_space<vmem>>, vector<1x32xf32>
    %127 = vector.broadcast %126 : vector<1x32xf32> to vector<16x32xf32>
    %128 = arith.addf %125, %127 : vector<16x32xf32>
    %cst_53 = arith.constant 0.000000e+00 : f32
    %129 = vector.broadcast %cst_53 : f32 to vector<16x32xf32>
    %130 = arith.maximumf %128, %129 : vector<16x32xf32>
    %c0_54 = arith.constant 0 : index
    %c0_55 = arith.constant 0 : index
    %131 = vector.load %arg7[%c0_54, %c0_55] : memref<16x32xf32, #tpu.memory_space<vmem>>, vector<16x32xf32>
    tpu.vector_store %arg7[%c0_54, %c0_55], %130 {strides = array<i32>} : memref<16x32xf32, #tpu.memory_space<vmem>>, vector<16x32xf32>,
    return
  }
}

</mosaic_0001>

<bundles_post_ra>
// kernel: tpu_custom_call.1
= control target key start
LH: loop header
LB: loop body
LE: loop exit
PB: predicated region body
PF: predicated region fallthrough
CT: control target
= control target key end

     0   :  { %12 = vsyncpa [#allocation4], 0  ;;  %s1798_s0 = inlined_call_operand.hbm [shape: f32[16,16], index: 0, kind: input, shape index: {}]   ;;  %s1799_s1 = inlined_call_operand.hbm [shape: f32[4,16], index: 1, kind: input, shape index: {}]   ;;  %s1800_s2 = inlined_call_operand.hbm [shape: f32[16,32], index: 2, kind: input, shape index: {}]   ;;  %s1801_s3 = inlined_call_operand.hbm [shape: f32[32,32], index: 3, kind: input, shape index: {}]   ;;  %s1802_s4 = inlined_call_operand.vmem [shape: f32[1,32], index: 4, kind: input, shape index: {}]   ;;  %s1803_s5 = inlined_call_operand.hbm [shape: f32[32,32], index: 5, kind: input, shape index: {}]   ;;  %s1804_s6 = inlined_call_operand.vmem [shape: f32[1,32], index: 6, kind: input, shape index: {}]   ;;  %s1805_s7 = inlined_call_operand.hbm [shape: f32[16,32], index: 7, kind: output, shape index: {}]  }
   0x1   :  { %13 = vsyncpa [#allocation7], 0 }
   0x2   :  { %14 = vsyncpa [#allocation10], 0 }
   0x3   :  { %15 = vsyncpa [#allocation5], 0  ;;  %s1502_s24 = smov [#allocation6]   ;;  %s1362_s28 = scalar_lea.hbm %s1799_s1, 64 }
   0x4   :  { %s34_s25 = sshll.u32 %s1502_s24, 4  ;;  %p1363_p0 = scmp.ne.s32.totalorder %s1799_s1, %s1362_s28  ;;  %s35_s25 = int_to_ptr.vmem [resolvable:$true] %s34_s25 }
   0x5   :  { %p1366_p1 = scmp.lt.u32.totalorder %s1362_s28, %s1799_s1 }
   0x7   :  { %p1368_p2 = pnand %p1366_p1, %p1363_p0 }
   0x9   :  { %1371 = shalt.err (!%p1368_p2)
}
   0xa   :  { %s1372_s10 = scalar_lea.vmem %s35_s25, 64  ;;  %p1377_p4 = scmp.lt.s32.totalorder %s35_s25, %s35_s25 }
   0xb   :  { %p1373_p3 = scmp.ne.s32.totalorder %s35_s25, %s1372_s10  ;;  %p1378_p5 = scmp.lt.s32.totalorder %s1372_s10, %s1372_s10 }
   0xd   :  { %p1379_p6 = por %p1378_p5, %p1377_p4 }
   0xf   :  { %p1380_p7 = pnand %p1379_p6, %p1373_p3 }
  0x11   :  { %1383 = shalt.err (!%p1380_p7)
}
  0x12   :  { %37 = dma.hbm_to_vmem [thread:$0]  %s1799_s1, 64, %s35_s25, [#allocation7]  }
  0x13   :  { %s1503_s13 = smov [#allocation9]   ;;  %s1504_s15 = smov [#allocation3]  }
  0x14   :  { %s55_s14 = sshll.u32 %s1503_s13, 4  ;;  %s21_s16 = sshll.u32 %s1504_s15, 4  ;;  %s56_s14 = int_to_ptr.vmem [resolvable:$true] %s55_s14  ;;  %s22_s16 = int_to_ptr.vmem [resolvable:$true] %s21_s16 }
  0x15   :  { %s1384_s19 = scalar_lea.hbm %s1801_s3, 512 }
  0x16   :  { %p1385_p8 = scmp.ne.s32.totalorder %s1801_s3, %s1384_s19  ;;  %p1388_p9 = scmp.lt.u32.totalorder %s1384_s19, %s1801_s3 }
  0x18   :  { %p1390_p10 = pnand %p1388_p9, %p1385_p8 }
  0x1a   :  { %1393 = shalt.err (!%p1390_p10)
}
  0x1b   :  { %s1394_s1 = scalar_lea.vmem %s56_s14, 512  ;;  %p1399_p12 = scmp.lt.s32.totalorder %s56_s14, %s56_s14 }
  0x1c   :  { %p1395_p11 = scmp.ne.s32.totalorder %s56_s14, %s1394_s1  ;;  %p1400_p13 = scmp.lt.s32.totalorder %s1394_s1, %s1394_s1 }
  0x1e   :  { %p1401_p0 = por %p1400_p13, %p1399_p12 }
  0x20   :  { %p1402_p1 = pnand %p1401_p0, %p1395_p11 }
  0x22   :  { %1405 = shalt.err (!%p1402_p1)
}
  0x23   :  { %s1505_s24 = smov 128   ;;  %s1506_s25 = smov 8  }
  0x24   :  { %61 = dma.hbm_to_vmem [thread:$0]  %s1801_s3, 512, %s56_s14, [#allocation10], %s1505_s24, %s1505_s24, %s1506_s25  }
  0x25   :  { %s1406_s30 = scalar_lea.hbm %s1798_s0, 256 }
  0x26   :  { %p1407_p2 = scmp.ne.s32.totalorder %s1798_s0, %s1406_s30  ;;  %p1410_p3 = scmp.lt.u32.totalorder %s1406_s30, %s1798_s0 }
  0x28   :  { %p1412_p4 = pnand %p1410_p3, %p1407_p2 }
  0x2a   :  { %1415 = shalt.err (!%p1412_p4)
}
  0x2b   :  { %s1416_s12 = scalar_lea.vmem %s22_s16, 256  ;;  %p1421_p6 = scmp.lt.s32.totalorder %s22_s16, %s22_s16 }
  0x2c   :  { %p1417_p5 = scmp.ne.s32.totalorder %s22_s16, %s1416_s12  ;;  %p1422_p7 = scmp.lt.s32.totalorder %s1416_s12, %s1416_s12 }
  0x2e   :  { %p1423_p8 = por %p1422_p7, %p1421_p6 }
  0x30   :  { %p1424_p9 = pnand %p1423_p8, %p1417_p5 }
  0x32   :  { %1427 = shalt.err (!%p1424_p9)
}
  0x33   :  { %27 = dma.hbm_to_vmem [thread:$0]  %s1798_s0, 256, %s22_s16, [#allocation4], %s1505_s24, %s1505_s24, %s1506_s25  }
  0x34   :  { %s1507_s14 = smov [#allocation8]   ;;  %s1508_s17 = smov [#allocation11]  }
  0x35   :  { %s43_s15 = sshll.u32 %s1507_s14, 4  ;;  %s69_s18 = sshll.u32 %s1508_s17, 4  ;;  %s44_s15 = int_to_ptr.vmem [resolvable:$true] %s43_s15  ;;  %s70_s18 = int_to_ptr.vmem [resolvable:$true] %s69_s18 }
  0x36   :  { %s1428_s21 = scalar_lea.hbm %s1800_s2, 256 }
  0x37   :  { %p1429_p10 = scmp.ne.s32.totalorder %s1800_s2, %s1428_s21  ;;  %p1432_p11 = scmp.lt.u32.totalorder %s1428_s21, %s1800_s2 }
  0x39   :  { %p1434_p12 = pnand %p1432_p11, %p1429_p10 }
  0x3b   :  { %1437 = shalt.err (!%p1434_p12)
}
  0x3c   :  { %s1438_s0 = scalar_lea.vmem %s44_s15, 256  ;;  %p1443_p0 = scmp.lt.s32.totalorder %s44_s15, %s44_s15 }
  0x3d   :  { %p1439_p13 = scmp.ne.s32.totalorder %s44_s15, %s1438_s0  ;;  %p1444_p1 = scmp.lt.s32.totalorder %s1438_s0, %s1438_s0 }
  0x3f   :  { %p1445_p2 = por %p1444_p1, %p1443_p0 }
  0x41   :  { %p1446_p3 = pnand %p1445_p2, %p1439_p13 }
  0x43   :  { %1449 = shalt.err (!%p1446_p3)
}
  0x44   :  { %49 = dma.hbm_to_vmem [thread:$0]  %s1800_s2, 256, %s44_s15, [#allocation7], %s1505_s24, %s1505_s24, %s1506_s25  }
  0x45   :  { %s1450_s30 = scalar_lea.hbm %s1803_s5, 512 }
  0x46   :  { %p1451_p4 = scmp.ne.s32.totalorder %s1803_s5, %s1450_s30  ;;  %p1454_p5 = scmp.lt.u32.totalorder %s1450_s30, %s1803_s5 }
  0x48   :  { %p1456_p6 = pnand %p1454_p5, %p1451_p4 }
  0x4a   :  { %1459 = shalt.err (!%p1456_p6)
}
  0x4b   :  { %s1460_s12 = scalar_lea.vmem %s70_s18, 512  ;;  %p1465_p8 = scmp.lt.s32.totalorder %s70_s18, %s70_s18 }
  0x4c   :  { %p1461_p7 = scmp.ne.s32.totalorder %s70_s18, %s1460_s12  ;;  %p1466_p9 = scmp.lt.s32.totalorder %s1460_s12, %s1460_s12 }
  0x4e   :  { %p1467_p10 = por %p1466_p9, %p1465_p8 }
  0x50   :  { %p1468_p11 = pnand %p1467_p10, %p1461_p7 }
  0x52   :  { %1471 = shalt.err (!%p1468_p11)
}
  0x53   :  { %75 = dma.hbm_to_vmem [thread:$0]  %s1803_s5, 512, %s70_s18, [#allocation10], %s1505_s24, %s1505_s24, %s1506_s25  }
  0x54   :  { %1494 = dma.done.wait [#allocation4], 256  }
  0x55   :  { %1495 = vsyncadd [#allocation4], 4294967040 }
  0x56   :  { %1496 = dma.done.wait [#allocation7], 320  }
  0x57   :  { %1497 = vsyncadd [#allocation7], 4294966976 }
  0x58   :  { %1498 = dma.done.wait [#allocation10], 1024  }
  0x59   :  { %1499 = vsyncadd [#allocation10], 4294966272  ;;  %v153_v0 = vlaneseq  ;;  %v1509_v1 = vmov 0.0   ;;  %vm1510_vm0 = vmmov 0   ;;  %vm159_vm1 = vcmask 130048   ;;  %v1641_v5 = vld [vmem:[#allocation3] sm:$0xff] }
  0x5a   :  { %1222 = vmatprep.subr.bf16.mxu0 %v1509_v1  ;;  %1226 = vmatprep.mubr.msk.bf16.mxu0 %vm1510_vm0, %v1509_v1  ;;  %vm1637_vm2 = vmpackc.low %vm159_vm1, %vm159_vm1  ;;  %v1643_v6 = vld [vmem:[#allocation3 + $0x8] sm:$0xff]  ;;  %v1645_v7 = vld [vmem:[#allocation6] sm:$0xf]  ;;  %vm107_vm3 = vcmask 261120   ;;  %s1511_s5 = smov 120   ;;  %s1512_s15 = smov 112  }
  0x5b   :  { %v1632_v2 = vshrl.u32 %v153_v0, 7  ;;  %v1649_v8 = vpack.c.bf16 %v1643_v6, %v1641_v5  ;;  %v101_v10 = vld [vmem:[#allocation9] sm:$0xff]  ;;  %v102_v11 = vld [vmem:[#allocation9 + $0x8] sm:$0xff]  ;;  %v103_v12 = vld [vmem:[#allocation9 + $0x10] sm:$0xff]  ;;  %s1513_s17 = smov 104   ;;  %vm379_vm8 = vcmask 64512  }
  0x5c   :  { %v105_v13 = vpack.c.bf16 %v102_v11, %v101_v10  ;;  %v104_v14 = vld [vmem:[#allocation9 + $0x18] sm:$0xff]  ;;  %v98_v17 = vld [vmem:[#allocation8] sm:$0xff]  ;;  %v1683_v48 = vld [vmem:[%s1802_s4] ss:$0 sm:$0xff]  ;;  %vm610_vm11 = vcmask 130112   ;;  %s1514_s4 = smov 16  }
  0x5d   :  { %v155_v3 = vsub.s32 0, %v1632_v2  ;;  %1316 = vmatprep.subr.msk.bf16.mxu1 %vm1637_vm2, %v1649_v8  ;;  %v106_v16 = vpack.c.bf16 %v104_v14, %v103_v12  ;;  %v99_v18 = vld [vmem:[#allocation8 + $0x8] sm:$0xff]  ;;  %v384_v49 = vsub.s32 1, %v1632_v2  ;;  %vm840_vm14 = vcmask 195712   ;;  %s1515_s18 = smov 24   ;;  %s1516_s21 = smov [#allocation12]  }
  0x5e   :  { %1319 = vmatpush3.bf16.xpose.msk.msra.mxu1 %vm1637_vm2, %v1649_v8  ;;  %1223 = vmatpush3.bf16.msra.mxu0 %v105_v13  ;;  %v100_v20 = vpack.c.bf16 %v99_v18, %v98_v17  ;;  %vm1070_vm15 = vcmask 261312   ;;  %s1142_s22 = sshll.u32 %s1516_s21, 4  ;;  %s1143_s22 = int_to_ptr.vmem [resolvable:$true] %s1142_s22 }
  0x5f   :  { %v156_v9 = vrot.slane %v1645_v7, %v155_v3  ;;  %1224 = vmatprep.subr.bf16.mxu0 %v1509_v1  ;;  %1237 = vmatprep.subr.bf16.mxu1 %v1509_v1  ;;  %v385_v50 = vrot.slane %v1645_v7, %v384_v49  ;;  %s1472_s23 = scalar_lea.vmem %s1143_s22, 256  ;;  %p1477_p13 = scmp.lt.s32.totalorder %s1143_s22, %s1143_s22 }
  0x60   :  { %p1473_p12 = scmp.ne.s32.totalorder %s1143_s22, %s1472_s23  ;;  %p1478_p0 = scmp.lt.s32.totalorder %s1472_s23, %s1472_s23 }
  0x61   :  { %v157_v15 = vmul.f32 %v156_v9, %v1641_v5  ;;  %v158_v19 = vmul.f32 %v156_v9, %v1643_v6  ;;  %v386_v51 = vmul.f32 %v385_v50, %v1641_v5  ;;  %v387_v53 = vmul.f32 %v385_v50, %v1643_v6 }
  0x62   :  { %1225 = vmatpush3.bf16.msra.mxu0 %v106_v16  ;;  %p1479_p1 = por %p1478_p0, %p1477_p13 }
  0x63   :  { %1234 = vmatprep.mubr.msk.f32.mxu1 %vm159_vm1, %v157_v15  ;;  %1243 = vmatprep.subr.bf16.mxu0 %v1509_v1 }
  0x64   :  { %p1480_p2 = pnand %p1479_p1, %p1473_p12 }
  0x65   :  { %1235 = vmatmul.mubr.msk.f32.vlgmr.msra.gmra.mrb[0].mxu1 %vm159_vm1, %v158_v19  ;;  %1227 = vmatmul.mubr.msk.bf16.vlgmr.msra.gmra.mrb[0].mxu0 %vm107_vm3, %v100_v20 }
  0x66   :  { %1239 = vmatprep.mubr.msk.bf16.mxu1 %vm1510_vm0, %v1509_v1  ;;  %1245 = vmatprep.mubr.msk.bf16.mxu0 %vm1510_vm0, %v1509_v1 }
 0x138   :  { %v1236_v21 = vpop.f32.mrb[0].mxu1  ;;  %v145_v22 = vpop.f32.mrb[0].mxu0 }
 0x139   :  { %v248_v23 = vmul.f32 %v1236_v21, %v1236_v21  ;;  %v238_v24 = vpop.f32.mrb[1].mxu1  ;;  %v1228_v25 = vpop.f32.mrb[1].mxu0 }
 0x13a   :  { %v247_v26 = vmul.f32 %v238_v24, %v238_v24  ;;  %v148_v27 = vpop.f32.mrb[2].mxu0 }
 0x13b   :  { %v250_v28 = vsel %vm159_vm1, %v248_v23, 0.0  ;;  %v1671_v29 = vpack.c.bf16 %v148_v27, %v145_v22  ;;  %v1229_v30 = vpop.f32.mrb[3].mxu0 }
 0x13c   :  { %v249_v31 = vsel %vm159_vm1, %v247_v26, 0.0 }
 0x13d   :  { %v251_v32 = vadd.f32 %v250_v28, %v249_v31  ;;  %1238 = vmatpush3.bf16.msra.mxu1 %v1671_v29 }
 0x13e   :  { %1322 = vmatprep.subr.msk.bf16.mxu1 %vm1637_vm2, %v1649_v8 }
 0x13f   :  { %v252_v33 = vrot.slane %v251_v32, 4 }
 0x141   :  { %v253_v34 = vadd.f32 %v252_v33, %v251_v32 }
 0x143   :  { %v254_v35 = vrot.slane %v253_v34, 2 }
 0x145   :  { %v255_v36 = vadd.f32 %v254_v35, %v253_v34 }
 0x147   :  { %v256_v37 = vrot.slane %v255_v36, 1 }
 0x149   :  { %v257_v38 = vadd.f32 %v256_v37, %v255_v36 }
 0x14b   :  { %v258_v39 = vmax.f32 %v257_v38, 1e-24 }
 0x14d   :  { %1354 = vrsqrt.f32 %v258_v39  ;;  %v615_v39 = vsub.s32 2, %v1632_v2 }
 0x157   :  { %v1355_v40 = vpop.eup %1354 }
 0x158   :  { %v260_v41 = vmul.f32 %v1355_v40, %v238_v24  ;;  %v261_v42 = vmul.f32 %v1355_v40, %v1236_v21 }
 0x15a   :  { %v262_v43 = vand.u32 2147483647, %v260_v41  ;;  %v263_v44 = vand.u32 2147483647, %v261_v42 }
 0x15c   :  { %vm264_vm4 = vcmp.gt.f32.partialorder %v262_v43, 0.05  ;;  %vm265_vm5 = vcmp.gt.f32.partialorder %v263_v44, 0.05  ;;  %v616_v44 = vrot.slane %v1645_v7, %v615_v39 }
 0x15d   :  { %v266_v45 = vsel %vm264_vm4, %v260_v41, 0.0  ;;  %v267_v46 = vsel %vm265_vm5, %v261_v42, 0.0 }
 0x15e   :  { %v268_v47 = vpack.c.bf16 %v267_v46, %v266_v45  ;;  %v617_v46 = vmul.f32 %v616_v44, %v1641_v5 }
 0x160   :  { %275 = vxpose.xlu0.c.b16.start.end [1/1] (short) (narrow) %v268_v47, 16  ;;  %v618_v47 = vmul.f32 %v616_v44, %v1643_v6 }
 0x169   :  { %508 = vrot.lane.b32.xlu0 %v1671_v29, %s1511_s5 }
 0x16d   :  { %741 = vrot.lane.b32.xlu0 %v1683_v48, %s1512_s15 }
 0x171   :  { %968 = vrot.lane.b32.xlu0 %v1671_v29, %s1513_s17 }
 0x1c6   :  { %v283_v52 = vpop.trf.xlu0 }
 0x1c7   :  { %1240 = vmatmul.mubr.msk.bf16.vlgmr.msra.gmra.mrb[4].mxu1 %vm159_vm1, %v283_v52 }
 0x1c8   :  { %1325 = vmatpush3.bf16.xpose.msk.msra.mxu1 %vm1637_vm2, %v1649_v8  ;;  %1253 = vmatprep.mubr.msk.f32.mxu1 %vm159_vm1, %v386_v51 }
 0x1c9   :  { %1262 = vmatprep.subr.bf16.mxu1 %v1509_v1 }
 0x1cf   :  { %1254 = vmatmul.mubr.msk.f32.vlgmr.msra.gmra.mrb[2].mxu1 %vm159_vm1, %v387_v53 }
 0x1d0   :  { %1264 = vmatprep.mubr.msk.bf16.mxu1 %vm1510_vm0, %v1509_v1 }
 0x1db   :  { %v509_v11 = vpop.permute.xlu0 %508 }
 0x29a   :  { %v328_v54 = vpop.f32.mrb[4].mxu1 }
 0x29b   :  { %v329_v55 = vadd.f32 %v1683_v48, %v328_v54  ;;  %v1241_v56 = vpop.f32.mrb[5].mxu1 }
 0x29c   :  { %v331_v57 = vpop.f32.mrb[6].mxu1 }
 0x29d   :  { %v332_v58 = vadd.f32 %v1683_v48, %v331_v57  ;;  %v1242_v59 = vpop.f32.mrb[7].mxu1  ;;  %v335_v60 = vmax.f32 %v329_v55, 0.0 }
 0x29f   :  { %v336_v61 = vmax.f32 %v332_v58, 0.0 }
 0x2a1   :  { %v337_v62 = vpack.c.bf16 %v336_v61, %v335_v60 }
 0x2a2   :  { %v1255_v63 = vpop.f32.mrb[2].mxu1 }
 0x2a3   :  { %v470_v0 = vmul.f32 %v1255_v63, %v1255_v63  ;;  %1244 = vmatpush3.bf16.msra.mxu0 %v337_v62  ;;  %v460_v3 = vpop.f32.mrb[3].mxu1 }
 0x2a4   :  { %v469_v9 = vmul.f32 %v460_v3, %v460_v3  ;;  %1256 = vmatprep.subr.bf16.mxu0 %v1509_v1 }
 0x2a5   :  { %v472_v10 = vsel %vm159_vm1, %v470_v0, 0.0 }
 0x2a6   :  { %v471_v12 = vsel %vm159_vm1, %v469_v9, 0.0  ;;  %1246 = vmatmul.mubr.msk.bf16.vlgmr.msra.gmra.mrb[4].mxu0 %vm159_vm1, %v283_v52 }
 0x2a7   :  { %v473_v13 = vadd.f32 %v472_v10, %v471_v12  ;;  %1257 = vmatpush3.bf16.msra.mxu0 %v509_v11  ;;  %1258 = vmatprep.mubr.msk.bf16.mxu0 %vm1510_vm0, %v1509_v1 }
 0x2a8   :  { %1281 = vmatprep.subr.bf16.mxu0 %v1509_v1 }
 0x2a9   :  { %v474_v14 = vrot.slane %v473_v13, 4 }
 0x2ab   :  { %v475_v15 = vadd.f32 %v474_v14, %v473_v13 }
 0x2ad   :  { %v476_v16 = vrot.slane %v475_v15, 2 }
 0x2af   :  { %v477_v17 = vadd.f32 %v476_v16, %v475_v15 }
 0x2b1   :  { %v478_v18 = vrot.slane %v477_v17, 1 }
 0x2b3   :  { %v479_v19 = vadd.f32 %v478_v18, %v477_v17 }
 0x2b5   :  { %v480_v20 = vmax.f32 %v479_v19, 1e-24  ;;  %v845_v19 = vsub.s32 3, %v1632_v2 }
 0x2b7   :  { %1356 = vrsqrt.f32 %v480_v20  ;;  %v846_v20 = vrot.slane %v1645_v7, %v845_v19  ;;  %v742_v7 = vpop.permute.xlu0 %741 }
 0x2c1   :  { %v1357_v21 = vpop.eup %1356 }
 0x2c2   :  { %v482_v22 = vmul.f32 %v1357_v21, %v460_v3  ;;  %v483_v23 = vmul.f32 %v1357_v21, %v1255_v63  ;;  %v847_v21 = vmul.f32 %v846_v20, %v1641_v5 }
 0x2c4   :  { %v484_v24 = vand.u32 2147483647, %v482_v22  ;;  %v485_v25 = vand.u32 2147483647, %v483_v23 }
 0x2c6   :  { %vm486_vm6 = vcmp.gt.f32.partialorder %v484_v24, 0.05  ;;  %vm487_vm7 = vcmp.gt.f32.partialorder %v485_v25, 0.05 }
 0x2c7   :  { %v488_v26 = vsel %vm486_vm6, %v482_v22, 0.0  ;;  %v489_v27 = vsel %vm487_vm7, %v483_v23, 0.0 }
 0x2c8   :  { %v490_v28 = vpack.c.bf16 %v489_v27, %v488_v26 }
 0x2ca   :  { %491 = vxpose.xlu1.c.b16.start.end [1/1] (short) (narrow) %v490_v28, 16 }
 0x2ce   :  { %511 = vrot.lane.b32.xlu1 %v1683_v48, %s1511_s5 }
 0x2d2   :  { %738 = vrot.lane.b32.xlu1 %v1671_v29, %s1512_s15 }
 0x330   :  { %v499_v30 = vpop.trf.xlu1 }
 0x331   :  { %1259 = vmatmul.mubr.msk.bf16.vlgmr.msra.gmra.mrb[8].mxu0 %vm159_vm1, %v499_v30 }
 0x332   :  { %1283 = vmatprep.mubr.msk.bf16.mxu0 %vm1510_vm0, %v1509_v1 }
 0x340   :  { %v512_v35 = vpop.permute.xlu1 %511 }
 0x344   :  { %v739_v49 = vpop.permute.xlu1 %738 }
 0x379   :  { %v372_v31 = vpop.f32.mrb[4].mxu0 }
 0x37a   :  { %380 = vst.msk [vmem:[#allocation2] sm:$0xff] %vm379_vm8, %v372_v31  ;;  %v1247_v32 = vpop.f32.mrb[5].mxu0 }
 0x37b   :  { %v375_v33 = vpop.f32.mrb[6].mxu0 }
 0x37c   :  { %381 = vst.msk [vmem:[#allocation2 + $0x8] sm:$0xff] %vm379_vm8, %v375_v33  ;;  %v1248_v34 = vpop.f32.mrb[7].mxu0 }
 0x404   :  { %v551_v36 = vpop.f32.mrb[8].mxu0 }
 0x405   :  { %v552_v37 = vadd.f32 %v551_v36, %v512_v35  ;;  %v1260_v38 = vpop.f32.mrb[9].mxu0 }
 0x406   :  { %v554_v29 = vpop.f32.mrb[10].mxu0 }
 0x407   :  { %v555_v40 = vadd.f32 %v554_v29, %v512_v35  ;;  %v1261_v41 = vpop.f32.mrb[11].mxu0  ;;  %v558_v42 = vmax.f32 %v552_v37, 0.0  ;;  %v969_v35 = vpop.permute.xlu0 %968 }
 0x409   :  { %v559_v43 = vmax.f32 %v555_v40, 0.0 }
 0x40b   :  { %v560_v45 = vpack.c.bf16 %v559_v43, %v558_v42 }
 0x40d   :  { %1263 = vmatpush3.bf16.msra.mxu1 %v560_v45 }
 0x40e   :  { %1328 = vmatprep.subr.msk.bf16.mxu1 %vm1637_vm2, %v1649_v8 }
 0x410   :  { %1265 = vmatmul.mubr.msk.bf16.vlgmr.msra.gmra.mrb[8].mxu1 %vm159_vm1, %v499_v30 }
 0x411   :  { %1272 = vmatprep.mubr.msk.f32.mxu1 %vm159_vm1, %v617_v46 }
 0x416   :  { %1331 = vmatpush3.bf16.xpose.msk.msra.mxu1 %vm1637_vm2, %v1649_v8 }
 0x417   :  { %1275 = vmatprep.subr.bf16.mxu1 %v1509_v1 }
 0x41d   :  { %1273 = vmatmul.mubr.msk.f32.vlgmr.msra.gmra.mrb[12].mxu1 %vm159_vm1, %v618_v47 }
 0x41e   :  { %1276 = vmatpush3.bf16.msra.mxu1 %v739_v49  ;;  %1277 = vmatprep.mubr.msk.bf16.mxu1 %vm1510_vm0, %v1509_v1 }
 0x41f   :  { %1334 = vmatprep.subr.msk.bf16.mxu1 %vm1637_vm2, %v1649_v8 }
 0x4e3   :  { %v1737_v50 = vpop.f32.mrb[8].mxu1 }
 0x4e4   :  { %v1266_v51 = vpop.f32.mrb[9].mxu1 }
 0x4e5   :  { %v598_v52 = vpop.f32.mrb[10].mxu1 }
 0x4e6   :  { %v1267_v53 = vpop.f32.mrb[11].mxu1 }
 0x4f0   :  { %v1274_v54 = vpop.f32.mrb[12].mxu1 }
 0x4f1   :  { %v701_v55 = vmul.f32 %v1274_v54, %v1274_v54  ;;  %v691_v56 = vpop.f32.mrb[13].mxu1 }
 0x4f2   :  { %v700_v57 = vmul.f32 %v691_v56, %v691_v56 }
 0x4f3   :  { %v703_v58 = vsel %vm159_vm1, %v701_v55, 0.0 }
 0x4f4   :  { %v702_v59 = vsel %vm159_vm1, %v700_v57, 0.0 }
 0x4f5   :  { %v704_v60 = vadd.f32 %v703_v58, %v702_v59 }
 0x4f7   :  { %v705_v61 = vrot.slane %v704_v60, 4 }
 0x4f9   :  { %v706_v62 = vadd.f32 %v705_v61, %v704_v60 }
 0x4fb   :  { %v707_v63 = vrot.slane %v706_v62, 2 }
 0x4fd   :  { %v708_v0 = vadd.f32 %v707_v63, %v706_v62 }
 0x4ff   :  { %v709_v3 = vrot.slane %v708_v0, 1 }
 0x501   :  { %v710_v9 = vadd.f32 %v709_v3, %v708_v0 }
 0x503   :  { %v711_v10 = vmax.f32 %v710_v9, 1e-24 }
 0x505   :  { %1358 = vrsqrt.f32 %v711_v10 }
 0x50f   :  { %v1359_v11 = vpop.eup %1358 }
 0x510   :  { %v713_v12 = vmul.f32 %v1359_v11, %v691_v56  ;;  %v714_v13 = vmul.f32 %v1359_v11, %v1274_v54 }
 0x512   :  { %v715_v14 = vand.u32 2147483647, %v713_v12  ;;  %v716_v15 = vand.u32 2147483647, %v714_v13 }
 0x514   :  { %vm717_vm9 = vcmp.gt.f32.partialorder %v715_v14, 0.05  ;;  %vm718_vm10 = vcmp.gt.f32.partialorder %v716_v15, 0.05  ;;  %v1077_v14 = vld [vmem:[#allocation11 + $0x8] sm:$0xff]  ;;  %v1078_v15 = vld [vmem:[#allocation11 + $0x10] sm:$0xff] }
 0x515   :  { %v719_v16 = vsel %vm717_vm9, %v713_v12, 0.0  ;;  %v720_v17 = vsel %vm718_vm10, %v714_v13, 0.0  ;;  %v1076_v13 = vld [vmem:[#allocation11] sm:$0xff] }
 0x516   :  { %v721_v18 = vpack.c.bf16 %v720_v17, %v719_v16  ;;  %v1080_v16 = vpack.c.bf16 %v1077_v14, %v1076_v13  ;;  %v1079_v17 = vld [vmem:[#allocation11 + $0x18] sm:$0xff] }
 0x518   :  { %722 = vxpose.xlu1.c.b16.start.end [1/1] (short) (narrow) %v721_v18, 16  ;;  %v1081_v18 = vpack.c.bf16 %v1079_v17, %v1078_v15 }
 0x51c   :  { %971 = vrot.lane.b32.xlu1 %v1683_v48, %s1513_s17  ;;  %v848_v48 = vmul.f32 %v846_v20, %v1643_v6 }
 0x520   :  { %606 = vrot.lane.b32.xlu1 %v598_v52, %s1506_s25 }
 0x57e   :  { %v730_v22 = vpop.trf.xlu1 }
 0x57f   :  { %1278 = vmatmul.mubr.msk.bf16.vlgmr.msra.gmra.mrb[16].mxu1 %vm159_vm1, %v730_v22 }
 0x580   :  { %1337 = vmatpush3.bf16.xpose.msk.msra.mxu1 %vm1637_vm2, %v1649_v8  ;;  %1291 = vmatprep.mubr.msk.f32.mxu1 %vm159_vm1, %v847_v21 }
 0x581   :  { %1300 = vmatprep.subr.bf16.mxu1 %v1509_v1 }
 0x587   :  { %1292 = vmatmul.mubr.msk.f32.vlgmr.msra.gmra.mrb[14].mxu1 %vm159_vm1, %v848_v48 }
 0x588   :  { %1302 = vmatprep.mubr.msk.bf16.mxu1 %vm1510_vm0, %v1509_v1 }
 0x58e   :  { %v1757_v2 = vpop.permute.xlu1 %971 }
 0x592   :  { %v607_v5 = vpop.permute.xlu1 %606 }
 0x593   :  { %612 = vst.msk [vmem:[#allocation2 + $0x8] sm:$0xff] %vm610_vm11, %v607_v5 }
 0x652   :  { %v781_v4 = vpop.f32.mrb[16].mxu1 }
 0x653   :  { %v782_v8 = vadd.f32 %v781_v4, %v742_v7  ;;  %v1279_v23 = vpop.f32.mrb[17].mxu1 }
 0x654   :  { %v784_v24 = vpop.f32.mrb[18].mxu1 }
 0x655   :  { %v785_v25 = vadd.f32 %v784_v24, %v742_v7  ;;  %v1280_v26 = vpop.f32.mrb[19].mxu1  ;;  %v788_v27 = vmax.f32 %v782_v8, 0.0 }
 0x657   :  { %v789_v6 = vmax.f32 %v785_v25, 0.0 }
 0x659   :  { %v790_v28 = vpack.c.bf16 %v789_v6, %v788_v27 }
 0x65a   :  { %v1293_v30 = vpop.f32.mrb[14].mxu1 }
 0x65b   :  { %v931_v31 = vmul.f32 %v1293_v30, %v1293_v30  ;;  %1282 = vmatpush3.bf16.msra.mxu0 %v790_v28  ;;  %v921_v32 = vpop.f32.mrb[15].mxu1 }
 0x65c   :  { %v930_v33 = vmul.f32 %v921_v32, %v921_v32  ;;  %1294 = vmatprep.subr.bf16.mxu0 %v1509_v1 }
 0x65d   :  { %v933_v34 = vsel %vm159_vm1, %v931_v31, 0.0 }
 0x65e   :  { %v932_v36 = vsel %vm159_vm1, %v930_v33, 0.0  ;;  %1284 = vmatmul.mubr.msk.bf16.vlgmr.msra.gmra.mrb[12].mxu0 %vm159_vm1, %v730_v22 }
 0x65f   :  { %v934_v37 = vadd.f32 %v933_v34, %v932_v36  ;;  %1295 = vmatpush3.bf16.msra.mxu0 %v969_v35  ;;  %1296 = vmatprep.mubr.msk.bf16.mxu0 %vm1510_vm0, %v1509_v1 }
 0x660   :  { %1306 = vmatprep.subr.bf16.mxu0 %v1509_v1 }
 0x661   :  { %v935_v38 = vrot.slane %v934_v37, 4 }
 0x663   :  { %v936_v39 = vadd.f32 %v935_v38, %v934_v37 }
 0x665   :  { %v937_v29 = vrot.slane %v936_v39, 2 }
 0x667   :  { %v938_v40 = vadd.f32 %v937_v29, %v936_v39 }
 0x669   :  { %v939_v41 = vrot.slane %v938_v40, 1 }
 0x66b   :  { %v940_v42 = vadd.f32 %v939_v41, %v938_v40 }
 0x66d   :  { %v941_v43 = vmax.f32 %v940_v42, 1e-24 }
 0x66f   :  { %1360 = vrsqrt.f32 %v941_v43 }
 0x679   :  { %v1361_v44 = vpop.eup %1360 }
 0x67a   :  { %v943_v45 = vmul.f32 %v1361_v44, %v921_v32  ;;  %v944_v46 = vmul.f32 %v1361_v44, %v1293_v30 }
 0x67c   :  { %v945_v47 = vand.u32 2147483647, %v943_v45  ;;  %v946_v49 = vand.u32 2147483647, %v944_v46 }
 0x67e   :  { %vm947_vm12 = vcmp.gt.f32.partialorder %v945_v47, 0.05  ;;  %vm948_vm13 = vcmp.gt.f32.partialorder %v946_v49, 0.05 }
 0x67f   :  { %v949_v51 = vsel %vm947_vm12, %v943_v45, 0.0  ;;  %v950_v52 = vsel %vm948_vm13, %v944_v46, 0.0 }
 0x680   :  { %v951_v53 = vpack.c.bf16 %v950_v52, %v949_v51 }
 0x682   :  { %952 = vxpose.xlu0.c.b16.start.end [1/1] (short) (narrow) %v951_v53, 16 }
 0x68b   :  { %604 = vrot.lane.b32.xlu0 %v1737_v50, %s1506_s25 }
 0x6e8   :  { %v960_v54 = vpop.trf.xlu0 }
 0x6e9   :  { %1297 = vmatmul.mubr.msk.bf16.vlgmr.msra.gmra.mrb[16].mxu0 %vm159_vm1, %v960_v54 }
 0x6ea   :  { %1310 = vmatprep.mubr.msk.bf16.mxu0 %vm1510_vm0, %v1509_v1  ;;  %1307 = vmatpush3.bf16.msra.mxu0 %v1080_v16 }
 0x6eb   :  { %1308 = vmatprep.subr.bf16.mxu0 %v1509_v1  ;;  %v1182_v1 = vld [vmem:[%s1804_s6] ss:$0 sm:$0xff] }
 0x6ee   :  { %1309 = vmatpush3.bf16.msra.mxu0 %v1081_v18 }
 0x6fd   :  { %v605_v55 = vpop.permute.xlu0 %604 }
 0x6fe   :  { %611 = vst.msk [vmem:[#allocation2] sm:$0xff] %vm610_vm11, %v605_v55 }
 0x731   :  { %v825_v56 = vpop.f32.mrb[12].mxu0 }
 0x732   :  { %834 = vrot.lane.b32.xlu1 %v825_v56, %s1514_s4  ;;  %v1285_v57 = vpop.f32.mrb[13].mxu0 }
 0x733   :  { %v828_v58 = vpop.f32.mrb[14].mxu0 }
 0x734   :  { %v1286_v59 = vpop.f32.mrb[15].mxu0 }
 0x736   :  { %836 = vrot.lane.b32.xlu1 %v828_v58, %s1514_s4 }
 0x7a4   :  { %v835_v60 = vpop.permute.xlu1 %834 }
 0x7a5   :  { %841 = vst.msk [vmem:[#allocation2] sm:$0xff] %vm840_vm14, %v835_v60 }
 0x7a8   :  { %v837_v50 = vpop.permute.xlu1 %836 }
 0x7a9   :  { %842 = vst.msk [vmem:[#allocation2 + $0x8] sm:$0xff] %vm840_vm14, %v837_v50 }
 0x7bc   :  { %v1011_v61 = vpop.f32.mrb[16].mxu0 }
 0x7bd   :  { %v1012_v62 = vadd.f32 %v1011_v61, %v1757_v2  ;;  %v1298_v63 = vpop.f32.mrb[17].mxu0 }
 0x7be   :  { %v1014_v0 = vpop.f32.mrb[18].mxu0 }
 0x7bf   :  { %v1015_v3 = vadd.f32 %v1014_v0, %v1757_v2  ;;  %v1299_v9 = vpop.f32.mrb[19].mxu0  ;;  %v1018_v10 = vmax.f32 %v1012_v62, 0.0 }
 0x7c1   :  { %v1019_v11 = vmax.f32 %v1015_v3, 0.0 }
 0x7c3   :  { %v1020_v12 = vpack.c.bf16 %v1019_v11, %v1018_v10 }
 0x7c5   :  { %1301 = vmatpush3.bf16.msra.mxu1 %v1020_v12 }
 0x7c8   :  { %1303 = vmatmul.mubr.msk.bf16.vlgmr.msra.gmra.mrb[20].mxu1 %vm159_vm1, %v960_v54 }
 0x89b   :  { %v1055_v19 = vpop.f32.mrb[20].mxu1 }
 0x89c   :  { %1064 = vrot.lane.b32.xlu0 %v1055_v19, %s1515_s18  ;;  %v1304_v20 = vpop.f32.mrb[21].mxu1 }
 0x89d   :  { %v1058_v21 = vpop.f32.mrb[22].mxu1 }
 0x89e   :  { %1066 = vrot.lane.b32.xlu1 %v1058_v21, %s1515_s18  ;;  %v1305_v22 = vpop.f32.mrb[23].mxu1 }
 0x90e   :  { %v1065_v48 = vpop.permute.xlu0 %1064 }
 0x90f   :  { %1071 = vst.msk [vmem:[#allocation2] sm:$0xff] %vm1070_vm15, %v1065_v48 }
 0x910   :  { %v1067_v2 = vpop.permute.xlu1 %1066 }
 0x911   :  { %1072 = vst.msk [vmem:[#allocation2 + $0x8] sm:$0xff] %vm1070_vm15, %v1067_v2 }
 0x916   :  { %v1073_v5 = vld [vmem:[#allocation2] sm:$0xff] }
 0x918   :  { %v1074_v7 = vld [vmem:[#allocation2 + $0x8] sm:$0xff] }
 0x919   :  { %v1075_v4 = vpack.c.bf16 %v1074_v7, %v1073_v5 }
 0x91b   :  { %1311 = vmatmul.mubr.msk.bf16.vlgmr.msra.gmra.mrb[20].mxu0 %vm107_vm3, %v1075_v4 }
 0x9ee   :  { %v1126_v8 = vpop.f32.mrb[20].mxu0 }
 0x9ef   :  { %v1127_v23 = vadd.f32 %v1182_v1, %v1126_v8  ;;  %v1312_v24 = vpop.f32.mrb[21].mxu0 }
 0x9f0   :  { %v1129_v25 = vpop.f32.mrb[22].mxu0 }
 0x9f1   :  { %v1133_v26 = vmax.f32 %v1127_v23, 0.0  ;;  %v1130_v27 = vadd.f32 %v1182_v1, %v1129_v25  ;;  %v1313_v6 = vpop.f32.mrb[23].mxu0 }
 0x9f3   :  { %1135 = vst.msk [vmem:[#allocation12] sm:$0xff] %vm107_vm3, %v1133_v26  ;;  %v1134_v28 = vmax.f32 %v1130_v27, 0.0 }
 0x9f5   :  { %1136 = vst.msk [vmem:[#allocation12 + $0x8] sm:$0xff] %vm107_vm3, %v1134_v28 }
 0x9f6   :  { %1483 = shalt.err (!%p1480_p2)
}
 0x9f7   :  { %s1484_s26 = scalar_lea.hbm %s1805_s7, 256 }
 0x9f8   :  { %p1485_p3 = scmp.ne.s32.totalorder %s1805_s7, %s1484_s26  ;;  %p1488_p4 = scmp.lt.u32.totalorder %s1484_s26, %s1805_s7 }
 0x9fa   :  { %p1490_p5 = pnand %p1488_p4, %p1485_p3 }
 0x9fc   :  { %1493 = shalt.err (!%p1490_p5)
}
 0x9fd   :  { %1148 = dma.vmem_to_hbm [thread:$0]  %s1143_s22, 256, %s1805_s7, [#allocation5], %s1505_s24, %s1505_s24, %s1506_s25  }
 0x9fe   :  { %1500 = dma.done.wait [#allocation5], 256  }
 0x9ff   :  { %1501 = vsyncadd [#allocation5], 4294967040 }
 0xa00   :  { %1152 = vsyncpa [#allocation4], 1 }
 0xa01   :  { %1153 = vsyncpa [#allocation7], 1 }
 0xa02   :  { %1154 = vsyncpa [#allocation10], 1 }
 0xa03   :  { %1155 = vsyncpa [#allocation5], 1 }

</bundles_post_ra>
